<compile_context>
chip_gen: v6e
topology: v6e:2x2x1
jax: 0.10.0
libtpu: 0.0.40
codegen_flags: <defaults>
</compile_context>

<pallas_src>
import math

import jax
import jax.numpy as jnp
from jax import lax
from jax.experimental import pallas as pl
from jax.experimental.pallas import tpu as pltpu


# ----------------------------------------------------------------------------
# Pallas kernels
# ----------------------------------------------------------------------------
def _linear_kernel(x_ref, w_ref, b_ref, o_ref):
    # x: (TM, Cin) f32/bf16, w: (Cin, Cout) bf16, b: (1, Cout) f32 -> o: (TM, Cout)
    x = x_ref[...].astype(jnp.bfloat16)                       # bf16 MXU operands
    acc = jnp.dot(x, w_ref[...], preferred_element_type=jnp.float32)  # f32 accum
    o_ref[...] = (acc + b_ref[...]).astype(o_ref.dtype)


def _make_attn_kernel(num_head, d_k, tq, use_mask):
    """Attention kernel specialized on head count, q-tile size, mask presence."""
    C = num_head * d_k

    def kernel(*refs):
        if use_mask:
            qkv_ref, mask_ref, o_ref = refs
        else:
            qkv_ref, o_ref = refs

        # qkv_ref block: (1, N, 3C) bf16, resident across q-tiles of this batch.
        row0 = pl.multiple_of(pl.program_id(1) * tq, tq)

        bias = None
        if use_mask:
            # Additive bias built in-kernel from the raw mask (no HBM f32 bias),
            # computed once per grid step and reused across all heads.
            bias = jnp.where(mask_ref[0] == 0,
                             jnp.float32(-1e9), jnp.float32(0.0))

        for h in range(num_head):                              # static unroll
            lo = h * d_k
            # 1/sqrt(d_k) is already folded into wq/bq, so no in-kernel scale.
            qh = qkv_ref[0, pl.ds(row0, tq), pl.ds(lo, d_k)]          # (tq, dk) bf16
            kh = qkv_ref[0, :, pl.ds(C + lo, d_k)]                    # (N, dk)  bf16
            vh = qkv_ref[0, :, pl.ds(2 * C + lo, d_k)]                # (N, dk)  bf16

            # q @ k^T without an in-kernel transpose; bf16 in, f32 out.
            s = lax.dot_general(
                qh, kh,
                dimension_numbers=(((1,), (1,)), ((), ())),
                preferred_element_type=jnp.float32)                   # (tq, N) f32
            if bias is not None:
                s = s + bias

            m = jnp.max(s, axis=-1, keepdims=True)
            p = jnp.exp(s - m)                                        # f32 softmax math
            denom = jnp.sum(p, axis=-1, keepdims=True)

            # Post-PV normalization: scale the (tq, dk) result, not the (tq, N) probs.
            oh = jnp.dot(p.astype(vh.dtype), vh,
                         preferred_element_type=jnp.float32)          # (tq, dk) f32
            oh = oh * pl.reciprocal(denom, approx=True)

            # Write this head's slice straight into the lane-dense output block.
            o_ref[0, :, pl.ds(lo, d_k)] = oh.astype(o_ref.dtype)

    return kernel


# ----------------------------------------------------------------------------
# Wrappers
# ----------------------------------------------------------------------------
def pallas_linear(x2d, w, b, *, out_dtype, tile_m=512):
    """y = x @ w + b with w stored pre-transposed (Cin, Cout), bf16."""
    M, Cin = x2d.shape
    Cout = w.shape[1]
    tm = min(tile_m, M)
    grid_m = pl.cdiv(M, tm)
    cost = pl.CostEstimate(
        flops=2 * M * Cin * Cout,
        transcendentals=0,
        bytes_accessed=int(x2d.size * x2d.dtype.itemsize
                           + w.size * w.dtype.itemsize
                           + b.size * b.dtype.itemsize
                           + M * Cout * jnp.dtype(out_dtype).itemsize),
    )
    return pl.pallas_call(
        _linear_kernel,
        out_shape=jax.ShapeDtypeStruct((M, Cout), out_dtype),
        grid=(grid_m,),
        in_specs=[
            pl.BlockSpec((tm, Cin), lambda i: (i, 0)),
            # Constant index map -> fetched once, stays resident across M tiles.
            # TODO(synk): pl.Buffered(1) + Cout/K tiling for production C (v7x VMEM).
            pl.BlockSpec((Cin, Cout), lambda i: (0, 0)),
            pl.BlockSpec((1, Cout), lambda i: (0, 0)),
        ],
        out_specs=pl.BlockSpec((tm, Cout), lambda i: (i, 0)),
        compiler_params=pltpu.CompilerParams(dimension_semantics=("parallel",)),
        cost_estimate=cost,
    )(x2d, w, b.reshape(1, Cout))


def pallas_attention(qkv, num_head, mask=None):
    """Scaled dot-product attention over all heads.

    qkv: (B, N, 3C) bf16 slab [q | k | v] along channels (scale folded into q).
    mask: optional (B, N, N), any dtype; positions where mask == 0 get -1e9.
    Returns (B, N, C) bf16.
    """
    B, N, C3 = qkv.shape
    C = C3 // 3
    d_k = C // num_head
    tq = 128 if (N % 128 == 0) else N          # q-tile; full N for small demo shapes
    nq = N // tq
    use_mask = mask is not None

    kernel = _make_attn_kernel(num_head, d_k, tq, use_mask)
    in_specs = [pl.BlockSpec((1, N, C3), lambda b, q: (b, 0, 0))]  # resident over q
    args = [qkv]
    mask_bytes = 0
    if use_mask:
        in_specs.append(pl.BlockSpec((1, tq, N), lambda b, q: (b, q, 0)))
        args.append(mask)
        mask_bytes = int(mask.size * mask.dtype.itemsize)

    cost = pl.CostEstimate(
        flops=4 * B * num_head * N * N * d_k,
        transcendentals=B * num_head * N * N,
        bytes_accessed=int(qkv.size * qkv.dtype.itemsize) + 2 * B * N * C + mask_bytes,
    )
    return pl.pallas_call(
        kernel,
        out_shape=jax.ShapeDtypeStruct((B, N, C), jnp.bfloat16),
        grid=(B, nq),
        in_specs=in_specs,
        out_specs=pl.BlockSpec((1, tq, C), lambda b, q: (b, q, 0)),
        compiler_params=pltpu.CompilerParams(
            dimension_semantics=("parallel", "parallel")),
        cost_estimate=cost,
    )(*args)


def prepare_params(raw):
    """Fold 1/sqrt(d_k) into wq/bq, fuse QKV weights, cast weights to bf16."""
    H = raw["num_head"]
    C = raw["wq"].shape[0]
    scale = 1.0 / math.sqrt(C // H)
    wq = raw["wq"] * scale
    bq = raw["bq"] * scale
    return dict(
        num_head=H,
        # fused self-attention projection
        wqkv=jnp.concatenate([wq, raw["wk"], raw["wv"]], axis=1).astype(jnp.bfloat16),
        bqkv=jnp.concatenate([bq, raw["bk"], raw["bv"]]),
        # individual projections (cross-attention fallback)
        wq=wq.astype(jnp.bfloat16), bq=bq,
        wk=raw["wk"].astype(jnp.bfloat16), bk=raw["bk"],
        wv=raw["wv"].astype(jnp.bfloat16), bv=raw["bv"],
        wo=raw["wo"].astype(jnp.bfloat16), bo=raw["bo"],
    )


def multi_head_attention(params, query, key, value, mask=None):
    """Forward pass matching MultiHeadAttention.forward (eval mode)."""
    H = params["num_head"]
    B, N, C = query.shape

    if query is key and key is value:
        # Self-attention fast path: one fused projection, x read once,
        # lane-dense (B*N, 3C) bf16 output fed straight into attention.
        qkv = pallas_linear(query.reshape(B * N, C), params["wqkv"],
                            params["bqkv"], out_dtype=jnp.bfloat16)
        qkv = qkv.reshape(B, N, 3 * C)
    else:
        # General cross-attention fallback.
        # TODO(synk): avoid this XLA concat with a 3-ref attention variant if
        # cross-attention ever becomes the hot path.
        q = pallas_linear(query.reshape(B * N, C), params["wq"], params["bq"],
                          out_dtype=jnp.bfloat16)
        k = pallas_linear(key.reshape(B * N, C), params["wk"], params["bk"],
                          out_dtype=jnp.bfloat16)
        v = pallas_linear(value.reshape(B * N, C), params["wv"], params["bv"],
                          out_dtype=jnp.bfloat16)
        qkv = jnp.concatenate([q, k, v], axis=-1).reshape(B, N, 3 * C)

    out = pallas_attention(qkv, H, mask)                     # (B, N, C) bf16
    return pallas_linear(out.reshape(B * N, C), params["wo"], params["bo"],
                         out_dtype=query.dtype).reshape(B, N, C)


# ----------------------------------------------------------------------------
# Pure-JAX f32 reference (mirrors the PyTorch code) for a correctness check
# ----------------------------------------------------------------------------
def reference_mha(raw, query, key, value, mask=None):
    H = raw["num_head"]
    B, N, C = query.shape
    dk = C // H

    def lin(x, w_t, b):
        return x @ w_t + b

    def split(x):
        return x.reshape(B, N, H, dk).transpose(0, 2, 1, 3)

    q = split(lin(query, raw["wq"], raw["bq"]))
    k = split(lin(key, raw["wk"], raw["bk"]))
    v = split(lin(value, raw["wv"], raw["bv"]))
    scores = jnp.einsum("bhqd,bhkd->bhqk", q, k) / math.sqrt(dk)
    if mask is not None:
        scores = jnp.where(mask[:, None] == 0, -1000000000.0, scores)
    attn = jax.nn.softmax(scores, axis=-1)
    out = jnp.einsum("bhqk,bhkd->bhqd", attn, v)
    out = out.transpose(0, 2, 1, 3).reshape(B, N, C)
    return lin(out, raw["wo"], raw["bo"])


# ----------------------------------------------------------------------------
# Main
# ----------------------------------------------------------------------------
if __name__ == "__main__":
    B, N, C, H = 2, 8, 32, 4

    key0 = jax.random.PRNGKey(0)
    keys = jax.random.split(key0, 14)

    bound = 1.0 / math.sqrt(C)  # nn.Linear default init range

    def init_linear(kw, kb):
        # Stored pre-transposed: (Cin, Cout) == PyTorch weight.T
        w_t = jax.random.uniform(kw, (C, C), jnp.float32, -bound, bound)
        b = jax.random.uniform(kb, (C,), jnp.float32, -bound, bound)
        return w_t, b

    wq, bq = init_linear(keys[0], keys[1])
    wk, bk = init_linear(keys[2], keys[3])
    wv, bv = init_linear(keys[4], keys[5])
    wo, bo = init_linear(keys[6], keys[7])

    raw = dict(num_head=H, wq=wq, bq=bq, wk=wk, bk=bk, wv=wv, bv=bv, wo=wo, bo=bo)
    params = prepare_params(raw)

    x = jax.random.normal(keys[8], (B, N, C), jnp.float32)

    # bf16 MXU operands -> compare against the f32 reference at bf16-level tolerance.
    TOL = dict(atol=3e-2, rtol=3e-2)

    # 1) Self-attention, no mask (fused QKV path, unmasked kernel variant).
    out = jax.block_until_ready(multi_head_attention(params, x, x, x, mask=None))
    ref = reference_mha(raw, x, x, x, mask=None)
    assert out.shape == (B, N, C)
    assert jnp.allclose(out, ref, **TOL), "self-attn unmasked mismatch vs reference"

    # 2) Self-attention with a causal mask broadcast over heads (mask.unsqueeze(1)).
    causal = jnp.tril(jnp.ones((N, N), jnp.float32))
    mask = jnp.broadcast_to(causal, (B, N, N))
    out_m = jax.block_until_ready(multi_head_attention(params, x, x, x, mask=mask))
    ref_m = reference_mha(raw, x, x, x, mask=mask)
    assert jnp.allclose(out_m, ref_m, **TOL), "self-attn masked mismatch vs reference"

    # 3) Cross-attention fallback path (distinct query / key / value tensors).
    q_in = jax.random.normal(keys[9], (B, N, C), jnp.float32)
    k_in = jax.random.normal(keys[10], (B, N, C), jnp.float32)
    v_in = jax.random.normal(keys[11], (B, N, C), jnp.float32)
    out_x = jax.block_until_ready(
        multi_head_attention(params, q_in, k_in, v_in, mask=mask))
    ref_x = reference_mha(raw, q_in, k_in, v_in, mask=mask)
    assert jnp.allclose(out_x, ref_x, **TOL), "cross-attn mismatch vs reference"

    print("KERNEL_OK")
</pallas_src>

<mosaic_0001>
module attributes {stable_mosaic.version = 11 : i64} {
  func.func @_linear_kernel(%arg0: i32, %arg1: memref<16x32xf32, #tpu.memory_space<vmem>>, %arg2: memref<32x96xbf16, #tpu.memory_space<vmem>>, %arg3: memref<1x96xf32, #tpu.memory_space<vmem>>, %arg4: memref<16x96xbf16, #tpu.memory_space<vmem>>) attributes {dimension_semantics = [#tpu.dimension_semantics<parallel>], iteration_bounds = array<i64: 1>, scalar_prefetch = 0 : i64, scratch_operands = 0 : i64, tpu.core_type = #tpu.core_type<tc>, window_params = [{transform_indices = @transform_0, window_bounds = array<i64: 16, 32>}, {pipeline_mode = #tpu.pipeline_mode<synchronous>, transform_indices = @transform_1, window_bounds = array<i64: 32, 96>}, {pipeline_mode = #tpu.pipeline_mode<synchronous>, transform_indices = @transform_2, window_bounds = array<i64: 1, 96>}, {transform_indices = @transform_3, window_bounds = array<i64: 16, 96>}]} {
    %c0 = arith.constant 0 : index
    %c0_0 = arith.constant 0 : index
    %0 = vector.load %arg1[%c0, %c0_0] : memref<16x32xf32, #tpu.memory_space<vmem>>, vector<16x32xf32>
    %1 = arith.truncf %0 : vector<16x32xf32> to vector<16x32xbf16>
    %c0_1 = arith.constant 0 : index
    %c0_2 = arith.constant 0 : index
    %2 = vector.load %arg2[%c0_1, %c0_2] : memref<32x96xbf16, #tpu.memory_space<vmem>>, vector<32x96xbf16>
    %cst = arith.constant dense<0.000000e+00> : vector<16x96xf32>
    %3 = tpu.matmul %1, %2, %cst {dimension_numbers = #tpu.dot_dimension_numbers<[1], [0], [0], [1], [0, 0, 1, 1], [], []>} : vector<16x32xbf16>, vector<32x96xbf16>, vector<16x96xf32> -> vector<16x96xf32>
    %c0_3 = arith.constant 0 : index
    %c0_4 = arith.constant 0 : index
    %4 = vector.load %arg3[%c0_3, %c0_4] : memref<1x96xf32, #tpu.memory_space<vmem>>, vector<1x96xf32>
    %5 = vector.broadcast %4 : vector<1x96xf32> to vector<16x96xf32>
    %6 = arith.addf %3, %5 : vector<16x96xf32>
    %7 = arith.truncf %6 : vector<16x96xf32> to vector<16x96xbf16>
    %c0_5 = arith.constant 0 : index
    %c0_6 = arith.constant 0 : index
    %8 = vector.load %arg4[%c0_5, %c0_6] : memref<16x96xbf16, #tpu.memory_space<vmem>>, vector<16x96xbf16>
    tpu.vector_store %arg4[%c0_5, %c0_6], %7 {strides = array<i32>} : memref<16x96xbf16, #tpu.memory_space<vmem>>, vector<16x96xbf16>,
    return
  }
  func.func @transform_0(%arg0: i32) -> (i32, i32) {
    %c0_i32 = arith.constant 0 : i32
    %c0_i32_0 = arith.constant 0 : i32
    return %arg0, %c0_i32 : i32, i32
  }
  func.func @transform_1(%arg0: i32) -> (i32, i32) {
    %c0_i32 = arith.constant 0 : i32
    %c0_i32_0 = arith.constant 0 : i32
    %c0_i32_1 = arith.constant 0 : i32
    return %c0_i32, %c0_i32_0 : i32, i32
  }
  func.func @transform_2(%arg0: i32) -> (i32, i32) {
    %c0_i32 = arith.constant 0 : i32
    %c0_i32_0 = arith.constant 0 : i32
    %c0_i32_1 = arith.constant 0 : i32
    return %c0_i32, %c0_i32_0 : i32, i32
  }
  func.func @transform_3(%arg0: i32) -> (i32, i32) {
    %c0_i32 = arith.constant 0 : i32
    %c0_i32_0 = arith.constant 0 : i32
    return %arg0, %c0_i32 : i32, i32
  }
}

</mosaic_0001>

<bundles_post_ra>
// kernel: tpu_custom_call.1
= control target key start
LH: loop header
LB: loop body
LE: loop exit
PB: predicated region body
PF: predicated region fallthrough
CT: control target
= control target key end

     0   :  { %8 = vsyncpa [#allocation3], 0  ;;  %s287_s0 = inlined_call_operand.hbm [shape: f32[16,32], index: 0, kind: input, shape index: {}]   ;;  %s288_s1 = inlined_call_operand.hbm [shape: bf16[32,96], index: 1, kind: input, shape index: {}]   ;;  %s289_s2 = inlined_call_operand.vmem [shape: f32[1,96], index: 2, kind: input, shape index: {}]   ;;  %s290_s3 = inlined_call_operand.hbm [shape: bf16[16,96], index: 3, kind: output, shape index: {}]  }
   0x1   :  { %9 = vsyncpa [#allocation6], 0 }
   0x2   :  { %10 = vsyncpa [#allocation4], 0  ;;  %s240_s12 = smov [#allocation2]  }
   0x3   :  { %s16_s13 = sshll.u32 %s240_s12, 4  ;;  %s17_s13 = int_to_ptr.vmem [resolvable:$true] %s16_s13 }
   0x4   :  { %s182_s14 = scalar_lea.vmem %s17_s13, 256  ;;  %p187_p1 = scmp.lt.s32.totalorder %s17_s13, %s17_s13 }
   0x5   :  { %p183_p0 = scmp.ne.s32.totalorder %s17_s13, %s182_s14  ;;  %p188_p2 = scmp.lt.s32.totalorder %s182_s14, %s182_s14 }
   0x7   :  { %p189_p3 = por %p188_p2, %p187_p1 }
   0x9   :  { %p190_p4 = pnand %p189_p3, %p183_p0 }
   0xb   :  { %193 = shalt.err (!%p190_p4)
}
   0xc   :  { %s241_s15 = smov 128   ;;  %s242_s16 = smov 8  }
   0xd   :  { %22 = dma.hbm_to_vmem [thread:$0]  %s287_s0, 256, %s17_s13, [#allocation3], %s241_s15, %s241_s15, %s242_s16  }
   0xe   :  { %s243_s19 = smov [#allocation5]  }
   0xf   :  { %s28_s20 = sshll.u32 %s243_s19, 4  ;;  %s29_s20 = int_to_ptr.vmem [resolvable:$true] %s28_s20 }
  0x10   :  { %s202_s21 = scalar_lea.vmem %s29_s20, 256  ;;  %p207_p6 = scmp.lt.s32.totalorder %s29_s20, %s29_s20 }
  0x11   :  { %p203_p5 = scmp.ne.s32.totalorder %s29_s20, %s202_s21  ;;  %p208_p7 = scmp.lt.s32.totalorder %s202_s21, %s202_s21 }
  0x13   :  { %p209_p8 = por %p208_p7, %p207_p6 }
  0x15   :  { %p210_p9 = pnand %p209_p8, %p203_p5 }
  0x17   :  { %213 = shalt.err (!%p210_p9)
}
  0x18   :  { %s244_s22 = smov 64   ;;  %s245_s23 = smov 4  }
  0x19   :  { %34 = dma.hbm_to_vmem [thread:$0]  %s288_s1, 256, %s29_s20, [#allocation6], %s244_s22, %s244_s22, %s245_s23  }
  0x1a   :  { %234 = dma.done.wait [#allocation3], 256  }
  0x1b   :  { %235 = vsyncadd [#allocation3], 4294967040 }
  0x1c   :  { %236 = dma.done.wait [#allocation6], 256  }
  0x1d   :  { %237 = vsyncadd [#allocation6], 4294967040  ;;  %v246_v0 = vmov 0.0   ;;  %vm247_vm0 = vmmov 0   ;;  %v172_v1 = vld [vmem:[#allocation5 + $0x8] sm:$0xff]   ;;  %v173_v2 = vld [vmem:[#allocation5] sm:$0xff]  }
  0x1e   :  { %155 = vmatprep.subr.bf16.mxu0 %v246_v0  ;;  %159 = vmatprep.mubr.msk.bf16.mxu0 %vm247_vm0, %v246_v0  ;;  %v44_v3 = vld [vmem:[#allocation2] sm:$0xff]  ;;  %v45_v4 = vld [vmem:[#allocation2 + $0x8] sm:$0xff]  ;;  %vm70_vm1 = vcmask 261120   ;;  %vm123_vm2 = vcmask 781312   ;;  %s248_s26 = smov [#allocation7]  }
  0x1f   :  { %156 = vmatpush3.bf16.msra.mxu0 %v172_v1  ;;  %v46_v5 = vpack.c.bf16 %v45_v4, %v44_v3  ;;  %v144_v6 = vld [vmem:[%s289_s2] ss:$0 sm:$0xff]  ;;  %s131_s27 = sshll.u32 %s248_s26, 4  ;;  %s132_s27 = int_to_ptr.vmem [resolvable:$true] %s131_s27 }
  0x20   :  { %157 = vmatprep.subr.bf16.mxu0 %v246_v0  ;;  %s214_s28 = scalar_lea.vmem %s132_s27, 128  ;;  %p219_p11 = scmp.lt.s32.totalorder %s132_s27, %s132_s27 }
  0x21   :  { %p215_p10 = scmp.ne.s32.totalorder %s132_s27, %s214_s28  ;;  %p220_p12 = scmp.lt.s32.totalorder %s214_s28, %s214_s28 }
  0x23   :  { %158 = vmatpush3.bf16.msra.mxu0 %v173_v2  ;;  %p221_p13 = por %p220_p12, %p219_p11 }
  0x25   :  { %p222_p0 = pnand %p221_p13, %p215_p10 }
  0x26   :  { %160 = vmatmul.mubr.msk.bf16.vlgmr.msra.gmra.mxu0 %vm70_vm1, %v46_v5 }
  0xe6   :  { %v108_v7 = vpop.f32.mrf.mxu0 }
  0xe7   :  { %v109_v8 = vadd.f32 %v144_v6, %v108_v7 }
  0xe8   :  { %v161_v9 = vpop.f32.mrf.mxu0 }
  0xe9   :  { %v150_v10 = vpack.c.bf16 %v109_v8, %v109_v8 }
  0xea   :  { %v111_v11 = vpop.f32.mrf.mxu0 }
  0xeb   :  { %v112_v12 = vadd.f32 %v144_v6, %v111_v11  ;;  %124 = vst.msk [vmem:[#allocation7] sm:$0xf] %vm123_vm2, %v150_v10 }
  0xec   :  { %v162_v13 = vpop.f32.mrf.mxu0 }
  0xed   :  { %v151_v14 = vpack.c.bf16 %v112_v12, %v112_v12 }
  0xef   :  { %125 = vst.msk [vmem:[#allocation7 + $0x4] sm:$0xf] %vm123_vm2, %v151_v14 }
  0xf0   :  { %225 = shalt.err (!%p222_p0)
}
  0xf1   :  { %137 = dma.vmem_to_hbm [thread:$0]  %s132_s27, 128, %s290_s3, [#allocation4], %s244_s22, %s244_s22, %s245_s23  }
  0xf2   :  { %238 = dma.done.wait [#allocation4], 128  }
  0xf3   :  { %239 = vsyncadd [#allocation4], 4294967168 }
  0xf4   :  { %141 = vsyncpa [#allocation3], 1 }
  0xf5   :  { %142 = vsyncpa [#allocation6], 1 }
  0xf6   :  { %143 = vsyncpa [#allocation4], 1 }

</bundles_post_ra>
